<compile_context>
chip_gen: v5e
topology: v5e:2x2
jax: 0.10.0
libtpu: 0.0.40
codegen_flags: <defaults>
</compile_context>

<pallas_src>
import functools

import jax
import jax.numpy as jnp
import numpy as np
from jax.experimental import pallas as pl
from jax.experimental.pallas import tpu as pltpu


def sin_kernel(x_ref, w_ref, b_ref, o_ref):
    # x_ref: (TILE_B, K)  pipelined batch tile (lane-dense packed rows)
    # w_ref: (K, N)       alpha-folded, block-diagonal weight (VMEM-resident)
    # b_ref: (1, N)       f32 packed bias (VMEM-resident)
    # o_ref: (TILE_B, N)
    x1 = jnp.dot(x_ref[...], w_ref[...], preferred_element_type=jnp.float32)
    o_ref[...] = jnp.sin(x1 + b_ref[...]).astype(o_ref.dtype)


def _round_up(x, m):
    return ((x + m - 1) // m) * m


def _choose_pack(B, in_dim, out_dim):
    """Pack factor for lane-dense rows. Weight footprint grows as pack^2."""
    if in_dim >= 128 and out_dim >= 128:
        return 1
    for p in (8, 4, 2):
        if B % p == 0 and (p * in_dim) * (p * out_dim) * 4 <= 8 * 1024 * 1024:
            return p
    return 1


@functools.partial(jax.jit, static_argnames=("tile_b",))
def sin_forward(x, w_t, b, alpha, *, tile_b=2048):
    """x: [B, in_dim], w_t: [in_dim, out_dim], b: [out_dim], alpha: scalar.
    Returns sin((alpha*x) @ w_t + b) of shape [B, out_dim]."""
    B, in_dim = x.shape
    out_dim = w_t.shape[1]

    # Fold alpha into the weight (exact: (alpha*x)@W == x@(alpha*W)).
    w_scaled = (jnp.asarray(alpha, w_t.dtype) * w_t).astype(w_t.dtype)

    # Lane-dense packing of rows (free row-major reshapes in the wrapper).
    pack = _choose_pack(B, in_dim, out_dim)
    Bp, Kp, Np = B // pack, pack * in_dim, pack * out_dim

    x_p = x.reshape(Bp, Kp)                                          # free view
    w_blk = jnp.kron(jnp.eye(pack, dtype=w_scaled.dtype), w_scaled)  # (Kp, Np)
    b_p = jnp.tile(b.reshape(-1).astype(jnp.float32), pack).reshape(1, Np)

    # Batch tiling over packed rows.  No jnp.pad: Pallas masks the ragged
    # last block (safe: purely per-row elementwise).  Keep >=2 grid steps
    # when possible so both v7x TensorCores get work.
    if Bp <= 8:
        tb = Bp
    else:
        tb = min(tile_b, _round_up(pl.cdiv(Bp, 2), 8), Bp)
    grid = (pl.cdiv(Bp, tb),)

    itemsize = jnp.dtype(x.dtype).itemsize
    cost = pl.CostEstimate(
        flops=2 * Bp * Kp * Np,
        transcendentals=Bp * Np,
        bytes_accessed=itemsize * (Bp * Kp + Kp * Np + Bp * Np) + 4 * Np,
    )

    out_p = pl.pallas_call(
        sin_kernel,
        out_shape=jax.ShapeDtypeStruct((Bp, Np), x.dtype),
        grid=grid,
        in_specs=[
            pl.BlockSpec((tb, Kp), lambda i: (i, 0)),    # x tile (pipelined)
            pl.BlockSpec((Kp, Np), lambda i: (0, 0)),    # weight (resident)
            pl.BlockSpec((1, Np), lambda i: (0, 0)),     # bias (resident)
        ],
        out_specs=pl.BlockSpec((tb, Np), lambda i: (i, 0)),
        compiler_params=pltpu.CompilerParams(
            dimension_semantics=("parallel",),           # shard batch steps across TCs
            vmem_limit_bytes=48 * 1024 * 1024,           # headroom vs v7x's 64 MiB VMEM
        ),
        cost_estimate=cost,
    )(x_p, w_blk, b_p)

    # Free row-major reshape: packed output rows are [y_{pr} | ... | y_{pr+p-1}].
    return out_p.reshape(B, out_dim)


def init_params(key, in_dim, out_dim, alpha, is_first):
    """Mirror init_weight + PyTorch Linear default bias init, deterministically."""
    kw, kb = jax.random.split(key)
    if is_first:
        bound_w = 1.0 / in_dim
    else:
        bound_w = float(np.sqrt(6.0 / in_dim)) / alpha
    # nn.Linear weight is [out_dim, in_dim]; store transposed [in_dim, out_dim].
    w_t = jax.random.uniform(kw, (in_dim, out_dim), jnp.float32,
                             minval=-bound_w, maxval=bound_w)
    # PyTorch default bias init: U(-1/sqrt(in_dim), 1/sqrt(in_dim)).
    bound_b = 1.0 / float(np.sqrt(in_dim))
    b = jax.random.uniform(kb, (out_dim,), jnp.float32,
                           minval=-bound_b, maxval=bound_b)
    return w_t, b


def _reference(x, w_t, b, alpha):
    return jnp.sin((alpha * x) @ w_t + b.reshape(1, -1))


if __name__ == "__main__":
    key = jax.random.PRNGKey(0)
    k_x, k_p, k_x2, k_x3 = jax.random.split(key, 4)

    in_dim, out_dim = 32, 64
    alpha = 3.0
    is_first = True
    w_t, b = init_params(k_p, in_dim, out_dim, alpha, is_first)

    # Small demo shape (pack=8 -> single [1,256]@[256,512] lane-dense step).
    B = 8
    x = jax.random.normal(k_x, (B, in_dim), dtype=jnp.float32)
    y = sin_forward(x, w_t, b, alpha)
    jax.block_until_ready(y)
    assert y.shape == (B, out_dim)
    np.testing.assert_allclose(np.asarray(y), np.asarray(_reference(x, w_t, b, alpha)),
                               rtol=1e-5, atol=1e-5)

    # Larger batch exercising the packed grid with >=2 steps.
    B2 = 1040
    x2 = jax.random.normal(k_x2, (B2, in_dim), dtype=jnp.float32)
    y2 = sin_forward(x2, w_t, b, alpha)
    jax.block_until_ready(y2)
    assert y2.shape == (B2, out_dim)
    np.testing.assert_allclose(np.asarray(y2), np.asarray(_reference(x2, w_t, b, alpha)),
                               rtol=1e-5, atol=1e-5)

    # Batch not divisible by the pack factor: falls back to pack=1 and
    # exercises the ragged (masked) last block instead of jnp.pad.
    B3 = 1037
    x3 = jax.random.normal(k_x3, (B3, in_dim), dtype=jnp.float32)
    y3 = sin_forward(x3, w_t, b, alpha)
    jax.block_until_ready(y3)
    assert y3.shape == (B3, out_dim)
    np.testing.assert_allclose(np.asarray(y3), np.asarray(_reference(x3, w_t, b, alpha)),
                               rtol=1e-5, atol=1e-5)

    print("KERNEL_OK")
</pallas_src>

<mosaic_0001>
module attributes {stable_mosaic.version = 11 : i64} {
  func.func @sin_kernel(%arg0: i32, %arg1: memref<1x256xf32, #tpu.memory_space<vmem>>, %arg2: memref<256x512xf32, #tpu.memory_space<vmem>>, %arg3: memref<1x512xf32, #tpu.memory_space<vmem>>, %arg4: memref<1x512xf32, #tpu.memory_space<vmem>>) attributes {dimension_semantics = [#tpu.dimension_semantics<parallel>], iteration_bounds = array<i64: 1>, scalar_prefetch = 0 : i64, scratch_operands = 0 : i64, tpu.core_type = #tpu.core_type<tc>, window_params = [{transform_indices = @transform_0, window_bounds = array<i64: 1, 256>}, {pipeline_mode = #tpu.pipeline_mode<synchronous>, transform_indices = @transform_1, window_bounds = array<i64: 256, 512>}, {pipeline_mode = #tpu.pipeline_mode<synchronous>, transform_indices = @transform_2, window_bounds = array<i64: 1, 512>}, {transform_indices = @transform_3, window_bounds = array<i64: 1, 512>}]} {
    %c0 = arith.constant 0 : index
    %c0_0 = arith.constant 0 : index
    %0 = vector.load %arg1[%c0, %c0_0] : memref<1x256xf32, #tpu.memory_space<vmem>>, vector<1x256xf32>
    %c0_1 = arith.constant 0 : index
    %c0_2 = arith.constant 0 : index
    %1 = vector.load %arg2[%c0_1, %c0_2] : memref<256x512xf32, #tpu.memory_space<vmem>>, vector<256x512xf32>
    %cst = arith.constant dense<0.000000e+00> : vector<1x512xf32>
    %2 = tpu.matmul %0, %1, %cst {dimension_numbers = #tpu.dot_dimension_numbers<[1], [0], [0], [1], [0, 0, 1, 1], [], []>} : vector<1x256xf32>, vector<256x512xf32>, vector<1x512xf32> -> vector<1x512xf32>
    %c0_3 = arith.constant 0 : index
    %c0_4 = arith.constant 0 : index
    %3 = vector.load %arg3[%c0_3, %c0_4] : memref<1x512xf32, #tpu.memory_space<vmem>>, vector<1x512xf32>
    %4 = arith.addf %2, %3 : vector<1x512xf32>
    %5 = math.sin %4 : vector<1x512xf32>
    %c0_5 = arith.constant 0 : index
    %c0_6 = arith.constant 0 : index
    %6 = vector.load %arg4[%c0_5, %c0_6] : memref<1x512xf32, #tpu.memory_space<vmem>>, vector<1x512xf32>
    tpu.vector_store %arg4[%c0_5, %c0_6], %5 {strides = array<i32>} : memref<1x512xf32, #tpu.memory_space<vmem>>, vector<1x512xf32>,
    return
  }
  func.func @transform_0(%arg0: i32) -> (i32, i32) {
    %c0_i32 = arith.constant 0 : i32
    %c0_i32_0 = arith.constant 0 : i32
    return %arg0, %c0_i32 : i32, i32
  }
  func.func @transform_1(%arg0: i32) -> (i32, i32) {
    %c0_i32 = arith.constant 0 : i32
    %c0_i32_0 = arith.constant 0 : i32
    %c0_i32_1 = arith.constant 0 : i32
    return %c0_i32, %c0_i32_0 : i32, i32
  }
  func.func @transform_2(%arg0: i32) -> (i32, i32) {
    %c0_i32 = arith.constant 0 : i32
    %c0_i32_0 = arith.constant 0 : i32
    %c0_i32_1 = arith.constant 0 : i32
    return %c0_i32, %c0_i32_0 : i32, i32
  }
  func.func @transform_3(%arg0: i32) -> (i32, i32) {
    %c0_i32 = arith.constant 0 : i32
    %c0_i32_0 = arith.constant 0 : i32
    return %arg0, %c0_i32 : i32, i32
  }
}

</mosaic_0001>

<bundles_post_ra>
// kernel: tile.8
= control target key start
LH: loop header
LB: loop body
LE: loop exit
PB: predicated region body
PF: predicated region fallthrough
CT: control target
= control target key end

     0   :  { %s22_s0 = inlined_call_operand.vmem [shape: f32[64], index: 0, kind: input, shape index: {}]   ;;  %s23_s1 = inlined_call_operand.vmem [shape: f32[8,64], index: 1, kind: output, shape index: {}]  }
   0x1   :  { %v4_v0 = vld [vmem:[%s22_s0] ss:$0 sm:$0xff] }
   0x2   :  { %5 = vst [vmem:[%s23_s1] sm:$0xff] %v4_v0 }

// kernel: tile.9
= control target key start
LH: loop header
LB: loop body
LE: loop exit
PB: predicated region body
PF: predicated region fallthrough
CT: control target
= control target key end

     0   :  { %vm3_vm0 = vcmask 523264   ;;  %s40_s8 = smov 64   ;;  %vm9_vm1 = vcmask 1048064   ;;  %s69_s0 = inlined_call_operand.vmem [shape: f32[8,64], index: 0, kind: input, shape index: {}]   ;;  %s70_s1 = inlined_call_operand.vmem [shape: f32[1,512], index: 1, kind: output, shape index: {}]  }
   0x1   :  { %v35_v0 = vld [vmem:[%s69_s0 + $0x1] ss:$2 sm:$0xf]   ;;  %v2_v1 = vld [vmem:[%s69_s0] ss:$2 sm:$0xf]  }
   0x2   :  { %7 = vrot.lane.b32.xlu0 %v35_v0, %s40_s8  ;;  %4 = vst.msk [vmem:[#allocation0] ss:$8 sm:$0xf] %vm3_vm0, %v2_v1  }
  0x74   :  { %v8_v2 = vpop.permute.xlu0 %7  }
  0x75   :  { %10 = vst.msk [vmem:[#allocation0] ss:$8 sm:$0xf] %vm9_vm1, %v8_v2  }
  0x7c   :  { %v13_v3 = vld [vmem:[#allocation0] sm:$0x1]  ;;  %v18_v4 = vld [vmem:[#allocation0 + $0x8] sm:$0x1]  ;;  %v24_v5 = vld [vmem:[#allocation0 + $0x10] sm:$0x1] }
  0x7d   :  { %16 = vst [vmem:[%s70_s1] sm:$0x1] %v13_v3  ;;  %v30_v6 = vld [vmem:[#allocation0 + $0x18] sm:$0x1] }
  0x7e   :  { %36 = vst [vmem:[%s70_s1 + $0x1] sm:$0x1] %v18_v4 }
  0x7f   :  { %37 = vst [vmem:[%s70_s1 + $0x2] sm:$0x1] %v24_v5 }
  0x80   :  { %38 = vst [vmem:[%s70_s1 + $0x3] sm:$0x1] %v30_v6 }

// kernel: sin_forward.1
= control target key start
LH: loop header
LB: loop body
LE: loop exit
PB: predicated region body
PF: predicated region fallthrough
CT: control target
= control target key end

     0   :  { %s1936_s1 = inlined_call_operand.vmem [shape: f32[256,512], index: 1, kind: input, shape index: {}]   ;;  %s1937_s0 = inlined_call_operand.vmem [shape: f32[1,256], index: 0, kind: input, shape index: {}]   ;;  %s1938_s2 = inlined_call_operand.vmem [shape: f32[1,512], index: 2, kind: input, shape index: {}]   ;;  %s1939_s3 = inlined_call_operand.vmem [shape: f32[1,512], index: 3, kind: output, shape index: {}]  }
   0x1   :  { %v75_v0 = vld [vmem:[%s1936_s1 + $0x1e0] sm:$0xff]  ;;  %v76_v1 = vld [vmem:[%s1936_s1 + $0x1e8] sm:$0xff] }
   0x2   :  { %v71_v2 = vld [vmem:[%s1936_s1 + $0x1c0] sm:$0xff]  ;;  %158 = vmatpush.msra.mxu0 %v75_v0  ;;  %198 = vmatpush.msra.mxu2 %v76_v1  ;;  %v72_v4 = vld [vmem:[%s1936_s1 + $0x1c8] sm:$0xff]  ;;  %v77_v0 = vld [vmem:[%s1936_s1 + $0x1f0] sm:$0xff] }
   0x3   :  { %v139_v3 = vld [vmem:[%s1936_s1 + $0x3e0] sm:$0xff]  ;;  %v140_v5 = vld [vmem:[%s1936_s1 + $0x3e8] sm:$0xff]  ;;  %v78_v1 = vld [vmem:[%s1936_s1 + $0x1f8] sm:$0xff] }
   0x4   :  { %178 = vmatpush.msra.mxu1 %v139_v3  ;;  %218 = vmatpush.msra.mxu3 %v140_v5  ;;  %v67_v6 = vld [vmem:[%s1936_s1 + $0x1a0] sm:$0xff]  ;;  %v68_v8 = vld [vmem:[%s1936_s1 + $0x1a8] sm:$0xff]  ;;  %v73_v5 = vld [vmem:[%s1936_s1 + $0x1d0] sm:$0xff] }
   0x5   :  { %v135_v7 = vld [vmem:[%s1936_s1 + $0x3c0] sm:$0xff]  ;;  %159 = vmatpush.msra.mxu0 %v71_v2  ;;  %199 = vmatpush.msra.mxu2 %v72_v4  ;;  %v136_v9 = vld [vmem:[%s1936_s1 + $0x3c8] sm:$0xff] }
   0x6   :  { %v131_v10 = vld [vmem:[%s1936_s1 + $0x3a0] sm:$0xff]  ;;  %179 = vmatpush.msra.mxu1 %v135_v7  ;;  %219 = vmatpush.msra.mxu3 %v136_v9  ;;  %v64_v12 = vld [vmem:[%s1936_s1 + $0x188] sm:$0xff]  ;;  %v74_v7 = vld [vmem:[%s1936_s1 + $0x1d8] sm:$0xff] }
   0x7   :  { %v63_v11 = vld [vmem:[%s1936_s1 + $0x180] sm:$0xff]  ;;  %v132_v13 = vld [vmem:[%s1936_s1 + $0x3a8] sm:$0xff]  ;;  %160 = vmatpush.msra.mxu0 %v67_v6  ;;  %200 = vmatpush.msra.mxu2 %v68_v8  ;;  %v141_v6 = vld [vmem:[%s1936_s1 + $0x3f0] sm:$0xff] }
   0x8   :  { %v127_v14 = vld [vmem:[%s1936_s1 + $0x380] sm:$0xff]  ;;  %v128_v15 = vld [vmem:[%s1936_s1 + $0x388] sm:$0xff]  ;;  %180 = vmatpush.msra.mxu1 %v131_v10  ;;  %220 = vmatpush.msra.mxu3 %v132_v13  ;;  %v142_v8 = vld [vmem:[%s1936_s1 + $0x3f8] sm:$0xff] }
   0x9   :  { %v59_v16 = vld [vmem:[%s1936_s1 + $0x160] sm:$0xff]  ;;  %v60_v17 = vld [vmem:[%s1936_s1 + $0x168] sm:$0xff]  ;;  %161 = vmatpush.msra.mxu0 %v63_v11  ;;  %201 = vmatpush.msra.mxu2 %v64_v12  ;;  %v69_v9 = vld [vmem:[%s1936_s1 + $0x1b0] sm:$0xff] }
   0xa   :  { %v123_v18 = vld [vmem:[%s1936_s1 + $0x360] sm:$0xff]  ;;  %v124_v19 = vld [vmem:[%s1936_s1 + $0x368] sm:$0xff]  ;;  %181 = vmatpush.msra.mxu1 %v127_v14  ;;  %221 = vmatpush.msra.mxu3 %v128_v15  ;;  %v137_v10 = vld [vmem:[%s1936_s1 + $0x3d0] sm:$0xff] }
   0xb   :  { %v55_v20 = vld [vmem:[%s1936_s1 + $0x140] sm:$0xff]  ;;  %v56_v21 = vld [vmem:[%s1936_s1 + $0x148] sm:$0xff]  ;;  %162 = vmatpush.msra.mxu0 %v59_v16  ;;  %202 = vmatpush.msra.mxu2 %v60_v17  ;;  %v70_v11 = vld [vmem:[%s1936_s1 + $0x1b8] sm:$0xff] }
   0xc   :  { %v119_v22 = vld [vmem:[%s1936_s1 + $0x340] sm:$0xff]  ;;  %v120_v23 = vld [vmem:[%s1936_s1 + $0x348] sm:$0xff]  ;;  %182 = vmatpush.msra.mxu1 %v123_v18  ;;  %222 = vmatpush.msra.mxu3 %v124_v19  ;;  %v138_v12 = vld [vmem:[%s1936_s1 + $0x3d8] sm:$0xff] }
   0xd   :  { %v51_v24 = vld [vmem:[%s1936_s1 + $0x120] sm:$0xff]  ;;  %v52_v25 = vld [vmem:[%s1936_s1 + $0x128] sm:$0xff]  ;;  %163 = vmatpush.msra.mxu0 %v55_v20  ;;  %203 = vmatpush.msra.mxu2 %v56_v21  ;;  %v65_v13 = vld [vmem:[%s1936_s1 + $0x190] sm:$0xff] }
   0xe   :  { %v115_v26 = vld [vmem:[%s1936_s1 + $0x320] sm:$0xff]  ;;  %v116_v27 = vld [vmem:[%s1936_s1 + $0x328] sm:$0xff]  ;;  %183 = vmatpush.msra.mxu1 %v119_v22  ;;  %223 = vmatpush.msra.mxu3 %v120_v23  ;;  %v133_v14 = vld [vmem:[%s1936_s1 + $0x3b0] sm:$0xff] }
   0xf   :  { %v47_v28 = vld [vmem:[%s1936_s1 + $0x100] sm:$0xff]  ;;  %v48_v29 = vld [vmem:[%s1936_s1 + $0x108] sm:$0xff]  ;;  %164 = vmatpush.msra.mxu0 %v51_v24  ;;  %204 = vmatpush.msra.mxu2 %v52_v25  ;;  %v66_v15 = vld [vmem:[%s1936_s1 + $0x198] sm:$0xff] }
  0x10   :  { %v111_v30 = vld [vmem:[%s1936_s1 + $0x300] sm:$0xff]  ;;  %v112_v31 = vld [vmem:[%s1936_s1 + $0x308] sm:$0xff]  ;;  %184 = vmatpush.msra.mxu1 %v115_v26  ;;  %224 = vmatpush.msra.mxu3 %v116_v27  ;;  %v134_v16 = vld [vmem:[%s1936_s1 + $0x3b8] sm:$0xff] }
  0x11   :  { %v43_v32 = vld [vmem:[%s1936_s1 + $0xe0] sm:$0xff]  ;;  %v44_v33 = vld [vmem:[%s1936_s1 + $0xe8] sm:$0xff]  ;;  %165 = vmatpush.msra.mxu0 %v47_v28  ;;  %205 = vmatpush.msra.mxu2 %v48_v29  ;;  %v61_v17 = vld [vmem:[%s1936_s1 + $0x170] sm:$0xff] }
  0x12   :  { %v107_v34 = vld [vmem:[%s1936_s1 + $0x2e0] sm:$0xff]  ;;  %v108_v35 = vld [vmem:[%s1936_s1 + $0x2e8] sm:$0xff]  ;;  %185 = vmatpush.msra.mxu1 %v111_v30  ;;  %225 = vmatpush.msra.mxu3 %v112_v31  ;;  %v129_v18 = vld [vmem:[%s1936_s1 + $0x390] sm:$0xff] }
  0x13   :  { %v39_v36 = vld [vmem:[%s1936_s1 + $0xc0] sm:$0xff]  ;;  %v40_v37 = vld [vmem:[%s1936_s1 + $0xc8] sm:$0xff]  ;;  %166 = vmatpush.msra.mxu0 %v43_v32  ;;  %206 = vmatpush.msra.mxu2 %v44_v33  ;;  %v62_v19 = vld [vmem:[%s1936_s1 + $0x178] sm:$0xff] }
  0x14   :  { %v103_v38 = vld [vmem:[%s1936_s1 + $0x2c0] sm:$0xff]  ;;  %v104_v39 = vld [vmem:[%s1936_s1 + $0x2c8] sm:$0xff]  ;;  %186 = vmatpush.msra.mxu1 %v107_v34  ;;  %226 = vmatpush.msra.mxu3 %v108_v35  ;;  %v130_v20 = vld [vmem:[%s1936_s1 + $0x398] sm:$0xff] }
  0x15   :  { %v35_v40 = vld [vmem:[%s1936_s1 + $0xa0] sm:$0xff]  ;;  %v36_v41 = vld [vmem:[%s1936_s1 + $0xa8] sm:$0xff]  ;;  %167 = vmatpush.msra.mxu0 %v39_v36  ;;  %207 = vmatpush.msra.mxu2 %v40_v37  ;;  %v57_v21 = vld [vmem:[%s1936_s1 + $0x150] sm:$0xff] }
  0x16   :  { %v99_v42 = vld [vmem:[%s1936_s1 + $0x2a0] sm:$0xff]  ;;  %v100_v43 = vld [vmem:[%s1936_s1 + $0x2a8] sm:$0xff]  ;;  %187 = vmatpush.msra.mxu1 %v103_v38  ;;  %227 = vmatpush.msra.mxu3 %v104_v39  ;;  %v125_v22 = vld [vmem:[%s1936_s1 + $0x370] sm:$0xff] }
  0x17   :  { %v31_v44 = vld [vmem:[%s1936_s1 + $0x80] sm:$0xff]  ;;  %v32_v45 = vld [vmem:[%s1936_s1 + $0x88] sm:$0xff]  ;;  %168 = vmatpush.msra.mxu0 %v35_v40  ;;  %208 = vmatpush.msra.mxu2 %v36_v41  ;;  %v58_v23 = vld [vmem:[%s1936_s1 + $0x158] sm:$0xff] }
  0x18   :  { %v95_v46 = vld [vmem:[%s1936_s1 + $0x280] sm:$0xff]  ;;  %v96_v47 = vld [vmem:[%s1936_s1 + $0x288] sm:$0xff]  ;;  %188 = vmatpush.msra.mxu1 %v99_v42  ;;  %228 = vmatpush.msra.mxu3 %v100_v43  ;;  %v126_v24 = vld [vmem:[%s1936_s1 + $0x378] sm:$0xff] }
  0x19   :  { %v27_v48 = vld [vmem:[%s1936_s1 + $0x60] sm:$0xff]  ;;  %v28_v49 = vld [vmem:[%s1936_s1 + $0x68] sm:$0xff]  ;;  %169 = vmatpush.msra.mxu0 %v31_v44  ;;  %209 = vmatpush.msra.mxu2 %v32_v45  ;;  %v53_v25 = vld [vmem:[%s1936_s1 + $0x130] sm:$0xff] }
  0x1a   :  { %v91_v50 = vld [vmem:[%s1936_s1 + $0x260] sm:$0xff]  ;;  %v92_v51 = vld [vmem:[%s1936_s1 + $0x268] sm:$0xff]  ;;  %189 = vmatpush.msra.mxu1 %v95_v46  ;;  %229 = vmatpush.msra.mxu3 %v96_v47  ;;  %v121_v26 = vld [vmem:[%s1936_s1 + $0x350] sm:$0xff] }
  0x1b   :  { %v23_v52 = vld [vmem:[%s1936_s1 + $0x40] sm:$0xff]  ;;  %v24_v53 = vld [vmem:[%s1936_s1 + $0x48] sm:$0xff]  ;;  %170 = vmatpush.msra.mxu0 %v27_v48  ;;  %210 = vmatpush.msra.mxu2 %v28_v49  ;;  %v54_v27 = vld [vmem:[%s1936_s1 + $0x138] sm:$0xff] }
  0x1c   :  { %v87_v54 = vld [vmem:[%s1936_s1 + $0x240] sm:$0xff]  ;;  %v88_v55 = vld [vmem:[%s1936_s1 + $0x248] sm:$0xff]  ;;  %190 = vmatpush.msra.mxu1 %v91_v50  ;;  %230 = vmatpush.msra.mxu3 %v92_v51  ;;  %v122_v28 = vld [vmem:[%s1936_s1 + $0x358] sm:$0xff] }
  0x1d   :  { %v14_v56 = vld [vmem:[%s1937_s0] sm:$0x3]  ;;  %v20_v58 = vld [vmem:[%s1936_s1 + $0x28] sm:$0xff]  ;;  %171 = vmatpush.msra.mxu0 %v23_v52  ;;  %211 = vmatpush.msra.mxu2 %v24_v53  ;;  %v49_v29 = vld [vmem:[%s1936_s1 + $0x110] sm:$0xff] }
  0x1e   :  { %v19_v57 = vld [vmem:[%s1936_s1 + $0x20] sm:$0xff]  ;;  %v84_v60 = vld [vmem:[%s1936_s1 + $0x228] sm:$0xff]  ;;  %191 = vmatpush.msra.mxu1 %v87_v54  ;;  %231 = vmatpush.msra.mxu3 %v88_v55  ;;  %v1196_v63 = vperm.slane %v14_v56, 0  ;;  %v1210_v4 = vperm.slane %v14_v56, 1  ;;  %v117_v30 = vld [vmem:[%s1936_s1 + $0x330] sm:$0xff] }
  0x1f   :  { %v83_v59 = vld [vmem:[%s1936_s1 + $0x220] sm:$0xff]  ;;  %v16_v62 = vld [vmem:[%s1936_s1 + $0x8] sm:$0xff]  ;;  %172 = vmatpush.msra.mxu0 %v19_v57  ;;  %212 = vmatpush.msra.mxu2 %v20_v58  ;;  %v50_v31 = vld [vmem:[%s1936_s1 + $0x118] sm:$0xff] }
  0x20   :  { %v15_v61 = vld [vmem:[%s1936_s1] sm:$0xff]  ;;  %192 = vmatpush.msra.mxu1 %v83_v59  ;;  %232 = vmatpush.msra.mxu3 %v84_v60  ;;  %v80_v3 = vld [vmem:[%s1936_s1 + $0x208] sm:$0xff]  ;;  %v118_v32 = vld [vmem:[%s1936_s1 + $0x338] sm:$0xff] }
  0x21   :  { %173 = vmatpush.msra.mxu0 %v15_v61  ;;  %213 = vmatpush.msra.mxu2 %v16_v62  ;;  %v79_v2 = vld [vmem:[%s1936_s1 + $0x200] sm:$0xff]  ;;  %v45_v33 = vld [vmem:[%s1936_s1 + $0xf0] sm:$0xff]  ;;  %v46_v35 = vld [vmem:[%s1936_s1 + $0xf8] sm:$0xff] }
  0x22   :  { %174 = vmatmul.f32.vlgmr.msra.gmra.mxu0 %v1196_v63  ;;  %214 = vmatmul.f32.vlgmr.msra.gmra.mxu2 %v1196_v63  ;;  %v113_v34 = vld [vmem:[%s1936_s1 + $0x310] sm:$0xff]  ;;  %v114_v36 = vld [vmem:[%s1936_s1 + $0x318] sm:$0xff] }
  0x23   :  { %238 = vmatpush.msrb.mxu0 %v77_v0  ;;  %278 = vmatpush.msrb.mxu2 %v78_v1  ;;  %v41_v37 = vld [vmem:[%s1936_s1 + $0xd0] sm:$0xff]  ;;  %v42_v39 = vld [vmem:[%s1936_s1 + $0xd8] sm:$0xff] }
  0x24   :  { %193 = vmatpush.msra.mxu1 %v79_v2  ;;  %233 = vmatpush.msra.mxu3 %v80_v3  ;;  %v109_v38 = vld [vmem:[%s1936_s1 + $0x2f0] sm:$0xff]  ;;  %v110_v40 = vld [vmem:[%s1936_s1 + $0x2f8] sm:$0xff] }
  0x25   :  { %194 = vmatmul.f32.vlgmr.msra.gmra.mxu1 %v1210_v4  ;;  %234 = vmatmul.f32.vlgmr.msra.gmra.mxu3 %v1210_v4  ;;  %v37_v41 = vld [vmem:[%s1936_s1 + $0xb0] sm:$0xff]  ;;  %v38_v43 = vld [vmem:[%s1936_s1 + $0xb8] sm:$0xff] }
  0x26   :  { %239 = vmatpush.msrb.mxu0 %v73_v5  ;;  %258 = vmatpush.msrb.mxu1 %v141_v6  ;;  %v105_v42 = vld [vmem:[%s1936_s1 + $0x2d0] sm:$0xff]  ;;  %v106_v44 = vld [vmem:[%s1936_s1 + $0x2d8] sm:$0xff]  ;;  %v1409_v5 = vld [vmem:[%s1938_s2] sm:$0xf] }
  0x27   :  { %279 = vmatpush.msrb.mxu2 %v74_v7  ;;  %298 = vmatpush.msrb.mxu3 %v142_v8  ;;  %v33_v45 = vld [vmem:[%s1936_s1 + $0x90] sm:$0xff]  ;;  %v34_v47 = vld [vmem:[%s1936_s1 + $0x98] sm:$0xff]  ;;  %v150_v6 = vperm.slane %v1409_v5, 0 }
  0x28   :  { %240 = vmatpush.msrb.mxu0 %v69_v9  ;;  %259 = vmatpush.msrb.mxu1 %v137_v10  ;;  %v101_v46 = vld [vmem:[%s1936_s1 + $0x2b0] sm:$0xff]  ;;  %v102_v48 = vld [vmem:[%s1936_s1 + $0x2b8] sm:$0xff]  ;;  %v151_v10 = vperm.slane %v1409_v5, 1 }
  0x29   :  { %280 = vmatpush.msrb.mxu2 %v70_v11  ;;  %299 = vmatpush.msrb.mxu3 %v138_v12  ;;  %v29_v49 = vld [vmem:[%s1936_s1 + $0x70] sm:$0xff]  ;;  %v30_v51 = vld [vmem:[%s1936_s1 + $0x78] sm:$0xff] }
  0x2a   :  { %241 = vmatpush.msrb.mxu0 %v65_v13  ;;  %260 = vmatpush.msrb.mxu1 %v133_v14  ;;  %v97_v50 = vld [vmem:[%s1936_s1 + $0x290] sm:$0xff]  ;;  %v98_v52 = vld [vmem:[%s1936_s1 + $0x298] sm:$0xff] }
  0x2b   :  { %281 = vmatpush.msrb.mxu2 %v66_v15  ;;  %300 = vmatpush.msrb.mxu3 %v134_v16  ;;  %v25_v53 = vld [vmem:[%s1936_s1 + $0x50] sm:$0xff]  ;;  %v26_v55 = vld [vmem:[%s1936_s1 + $0x58] sm:$0xff] }
  0x2c   :  { %242 = vmatpush.msrb.mxu0 %v61_v17  ;;  %261 = vmatpush.msrb.mxu1 %v129_v18  ;;  %v93_v54 = vld [vmem:[%s1936_s1 + $0x270] sm:$0xff]  ;;  %v94_v56 = vld [vmem:[%s1936_s1 + $0x278] sm:$0xff] }
  0x2d   :  { %282 = vmatpush.msrb.mxu2 %v62_v19  ;;  %301 = vmatpush.msrb.mxu3 %v130_v20  ;;  %v21_v57 = vld [vmem:[%s1936_s1 + $0x30] sm:$0xff]  ;;  %v22_v59 = vld [vmem:[%s1936_s1 + $0x38] sm:$0xff] }
  0x2e   :  { %243 = vmatpush.msrb.mxu0 %v57_v21  ;;  %262 = vmatpush.msrb.mxu1 %v125_v22  ;;  %v89_v58 = vld [vmem:[%s1936_s1 + $0x250] sm:$0xff]  ;;  %v90_v60 = vld [vmem:[%s1936_s1 + $0x258] sm:$0xff] }
  0x2f   :  { %283 = vmatpush.msrb.mxu2 %v58_v23  ;;  %302 = vmatpush.msrb.mxu3 %v126_v24  ;;  %v17_v61 = vld [vmem:[%s1936_s1 + $0x10] sm:$0xff]  ;;  %v18_v0 = vld [vmem:[%s1936_s1 + $0x18] sm:$0xff] }
  0x30   :  { %244 = vmatpush.msrb.mxu0 %v53_v25  ;;  %263 = vmatpush.msrb.mxu1 %v121_v26  ;;  %v85_v62 = vld [vmem:[%s1936_s1 + $0x230] sm:$0xff]  ;;  %v86_v1 = vld [vmem:[%s1936_s1 + $0x238] sm:$0xff] }
  0x31   :  { %284 = vmatpush.msrb.mxu2 %v54_v27  ;;  %303 = vmatpush.msrb.mxu3 %v122_v28  ;;  %v81_v2 = vld [vmem:[%s1936_s1 + $0x210] sm:$0xff]  ;;  %v82_v3 = vld [vmem:[%s1936_s1 + $0x218] sm:$0xff]  ;;  %v980_v27 = vmov 683565275  }
  0x32   :  { %245 = vmatpush.msrb.mxu0 %v49_v29  ;;  %264 = vmatpush.msrb.mxu1 %v117_v30  ;;  %v981_v29 = vmov 2475754826  }
  0x33   :  { %285 = vmatpush.msrb.mxu2 %v50_v31  ;;  %304 = vmatpush.msrb.mxu3 %v118_v32  ;;  %v982_v31 = vmov 2131351028  }
  0x34   :  { %246 = vmatpush.msrb.mxu0 %v45_v33  ;;  %265 = vmatpush.msrb.mxu1 %v113_v34  ;;  %v983_v33 = vmov 2102212464  }
  0x35   :  { %286 = vmatpush.msrb.mxu2 %v46_v35  ;;  %305 = vmatpush.msrb.mxu3 %v114_v36  ;;  %v984_v35 = vmov 920167782  }
  0x36   :  { %247 = vmatpush.msrb.mxu0 %v41_v37  ;;  %266 = vmatpush.msrb.mxu1 %v109_v38 }
  0x37   :  { %287 = vmatpush.msrb.mxu2 %v42_v39  ;;  %306 = vmatpush.msrb.mxu3 %v110_v40 }
  0x38   :  { %248 = vmatpush.msrb.mxu0 %v37_v41  ;;  %267 = vmatpush.msrb.mxu1 %v105_v42  ;;  %v985_v42 = vmov 1326507024  }
  0x39   :  { %288 = vmatpush.msrb.mxu2 %v38_v43  ;;  %307 = vmatpush.msrb.mxu3 %v106_v44 }
  0x3a   :  { %249 = vmatpush.msrb.mxu0 %v33_v45  ;;  %268 = vmatpush.msrb.mxu1 %v101_v46 }
  0x3b   :  { %289 = vmatpush.msrb.mxu2 %v34_v47  ;;  %308 = vmatpush.msrb.mxu3 %v102_v48 }
  0x3c   :  { %250 = vmatpush.msrb.mxu0 %v29_v49  ;;  %269 = vmatpush.msrb.mxu1 %v97_v50 }
  0x3d   :  { %290 = vmatpush.msrb.mxu2 %v30_v51  ;;  %309 = vmatpush.msrb.mxu3 %v98_v52 }
  0x3e   :  { %251 = vmatpush.msrb.mxu0 %v25_v53  ;;  %270 = vmatpush.msrb.mxu1 %v93_v54 }
  0x3f   :  { %291 = vmatpush.msrb.mxu2 %v26_v55  ;;  %310 = vmatpush.msrb.mxu3 %v94_v56 }
  0x40   :  { %252 = vmatpush.msrb.mxu0 %v21_v57  ;;  %271 = vmatpush.msrb.mxu1 %v89_v58 }
  0x41   :  { %292 = vmatpush.msrb.mxu2 %v22_v59  ;;  %311 = vmatpush.msrb.mxu3 %v90_v60 }
  0x42   :  { %253 = vmatpush.msrb.mxu0 %v17_v61  ;;  %272 = vmatpush.msrb.mxu1 %v85_v62 }
  0x43   :  { %293 = vmatpush.msrb.mxu2 %v18_v0  ;;  %312 = vmatpush.msrb.mxu3 %v86_v1 }
  0x44   :  { %254 = vmatmul.f32.vlgmr.msrb.gmra.mxu0 %v1196_v63  ;;  %294 = vmatmul.f32.vlgmr.msrb.gmra.mxu2 %v1196_v63 }
  0x45   :  { %273 = vmatpush.msrb.mxu1 %v81_v2  ;;  %313 = vmatpush.msrb.mxu3 %v82_v3 }
  0x46   :  { %274 = vmatmul.f32.vlgmr.msrb.gmra.mxu1 %v1210_v4  ;;  %314 = vmatmul.f32.vlgmr.msrb.gmra.mxu3 %v1210_v4 }
  0x9f   :  { %v175_v7 = vpop.f32.mrf.mxu0 }
  0xa0   :  { %v176_v8 = vadd.f32 %v175_v7, %v150_v6 }
  0xa2   :  { %v195_v9 = vpop.f32.mrf.mxu1 }
  0xa3   :  { %v1413_v11 = vadd.f32 %v195_v9, %v176_v8 }
  0xa5   :  { %v321_v63 = vand.u32 2139095040, %v1413_v11  ;;  %v215_v12 = vpop.f32.mrf.mxu2  ;;  %v318_v17 = vand.u32 2147483647, %v1413_v11 }
  0xa6   :  { %v216_v13 = vadd.f32 %v215_v12, %v151_v10 }
  0xa7   :  { %v322_v14 = vshrl.u32 %v321_v63, 23  ;;  %v325_v22 = vand.u32 8388607, %v318_v17 }
  0xa8   :  { %v235_v4 = vpop.f32.mrf.mxu3 }
  0xa9   :  { %v961_v15 = vadd.s32 4294967169, %v322_v14  ;;  %v1416_v16 = vadd.f32 %v235_v4, %v216_v13  ;;  %v326_v37 = vor.u32 8388608, %v325_v22 }
  0xab   :  { %v328_v18 = vadd.s32 1, %v961_v15  ;;  %v476_v19 = vand.u32 2139095040, %v1416_v16  ;;  %v473_v51 = vand.u32 2147483647, %v1416_v16  ;;  %v1460_v54 = vshll.u32 %v326_v37, 8 }
  0xad   :  { %vm329_vm0 = vcmp.gt.s32.totalorder %v328_v18, 0  ;;  %v477_v21 = vshrl.u32 %v476_v19, 23  ;;  %v480_v60 = vand.u32 8388607, %v473_v51  ;;  %v367_v62 = vand.u32 65535, %v1460_v54 }
  0xae   :  { %v330_v20 = vsel %vm329_vm0, %v328_v18, 0  ;;  %v368_v9 = vshrl.u32 %v1460_v54, 16 }
  0xaf   :  { %v332_v23 = vand.u32 31, %v330_v20  ;;  %v1422_v24 = vshrl.u32 %v330_v20, 5  ;;  %v964_v25 = vadd.s32 4294967169, %v477_v21  ;;  %v481_v3 = vor.u32 8388608, %v480_v60 }
  0xb1   :  { %v1424_v26 = vsub.s32 32, %v332_v23  ;;  %v335_v28 = vshll.u32 %v980_v27, %v332_v23  ;;  %v338_v30 = vshll.u32 %v981_v29, %v332_v23  ;;  %v341_v32 = vshll.u32 %v982_v31, %v332_v23 }
  0xb2   :  { %v344_v34 = vshll.u32 %v983_v33, %v332_v23  ;;  %v347_v36 = vshll.u32 %v984_v35, %v332_v23  ;;  %vm350_vm1 = vcmp.lt.s32.totalorder %v1422_v24, 1  ;;  %vm353_vm2 = vcmp.lt.s32.totalorder %v1422_v24, 4 }
  0xb3   :  { %v336_v38 = vshrl.u32 %v981_v29, %v1424_v26  ;;  %v339_v39 = vshrl.u32 %v982_v31, %v1424_v26  ;;  %v342_v40 = vshrl.u32 %v983_v33, %v1424_v26  ;;  %v345_v41 = vshrl.u32 %v984_v35, %v1424_v26 }
  0xb4   :  { %v348_v43 = vshrl.u32 %v985_v42, %v1424_v26  ;;  %v483_v47 = vadd.s32 1, %v964_v25  ;;  %vm352_vm3 = vcmp.lt.s32.totalorder %v1422_v24, 3  ;;  %vm351_vm4 = vcmp.lt.s32.totalorder %v1422_v24, 2 }
  0xb5   :  { %v1443_v44 = vor.u32 %v336_v38, %v335_v28  ;;  %v1445_v45 = vor.u32 %v339_v39, %v338_v30  ;;  %v1447_v46 = vor.u32 %v342_v40, %v341_v32  ;;  %v346_v48 = vor.u32 %v345_v41, %v344_v34 }
  0xb6   :  { %v349_v49 = vor.u32 %v348_v43, %v347_v36  ;;  %vm484_vm5 = vcmp.gt.s32.totalorder %v483_v47, 0  ;;  %v1489_v4 = vshll.u32 %v481_v3, 8 }
  0xb7   :  { %v362_v50 = vsel %vm350_vm1, %v1445_v45, %v1447_v46  ;;  %v359_v52 = vsel %vm353_vm2, %v346_v48, 920167782  ;;  %v358_v55 = vsel %vm350_vm1, %v1443_v44, %v1445_v45  ;;  %v485_v59 = vsel %vm484_vm5, %v483_v47, 0 }
  0xb8   :  { %v363_v53 = vsel %vm353_vm2, %v349_v49, 1326507024  ;;  %v360_v56 = vsel %vm352_vm3, %v1447_v46, %v359_v52  ;;  %v487_v1 = vand.u32 31, %v485_v59  ;;  %v1480_v8 = vshrl.u32 %v485_v59, 5 }
  0xb9   :  { %v364_v57 = vsel %vm352_vm3, %v346_v48, %v363_v53  ;;  %v361_v61 = vsel %vm351_vm4, %v358_v55, %v360_v56  ;;  %v986_v52 = vmov 0  }
  0xba   :  { %v365_v58 = vsel %vm351_vm4, %v362_v50, %v364_v57  ;;  %v392_v2 = vshrl.u32 %v361_v61, 16  ;;  %v391_v10 = vand.u32 65535, %v361_v61  ;;  %v1483_v63 = vsub.s32 32, %v487_v1 }
  0xbb   :  { %v370_v0 = vshrl.u32 %v365_v58, 16  ;;  %v369_v6 = vand.u32 65535, %v365_v58  ;;  %v490_v13 = vshll.u32 %v980_v27, %v487_v1  ;;  %v493_v14 = vshll.u32 %v981_v29, %v487_v1 }
  0xbc   :  { %v1485_v12 = vmul.u32 %v392_v2, %v367_v62  ;;  %vm505_vm6 = vcmp.lt.s32.totalorder %v1480_v8, 1  ;;  %vm506_vm7 = vcmp.lt.s32.totalorder %v1480_v8, 2  ;;  %v393_v20 = vmul.u32 %v391_v10, %v367_v62 }
  0xbd   :  { %v1478_v7 = vmul.u32 %v370_v0, %v367_v62  ;;  %v371_v15 = vmul.u32 %v369_v6, %v367_v62  ;;  %v1494_v19 = vmul.u32 %v369_v6, %v368_v9  ;;  %v491_v21 = vshrl.u32 %v981_v29, %v1483_v63 }
  0xbe   :  { %v494_v22 = vshrl.u32 %v982_v31, %v1483_v63  ;;  %v1500_v23 = vmul.u32 %v391_v10, %v368_v9  ;;  %v496_v25 = vshll.u32 %v982_v31, %v487_v1  ;;  %v497_v28 = vshrl.u32 %v983_v33, %v1483_v63 }
  0xbf   :  { %v375_v18 = vshll.u32 %v1478_v7, 16  ;;  %v499_v30 = vshll.u32 %v983_v33, %v487_v1  ;;  %v397_v32 = vshll.u32 %v1485_v12, 16  ;;  %v1507_v34 = vor.u32 %v491_v21, %v490_v13 }
  0xc0   :  { %v1509_v36 = vor.u32 %v494_v22, %v493_v14  ;;  %v500_v37 = vshrl.u32 %v984_v35, %v1483_v63  ;;  %v1513_v38 = vor.u32 %v497_v28, %v496_v25  ;;  %v502_v39 = vshll.u32 %v984_v35, %v487_v1 }
  0xc1   :  { %vm379_vm8 = vc.u32 %v371_v15, %v375_v18  ;;  %v503_v40 = vshrl.u32 %v985_v42, %v1483_v63  ;;  %v374_v41 = vmul.u32 %v370_v0, %v368_v9  ;;  %vm507_vm9 = vcmp.lt.s32.totalorder %v1480_v8, 3 }
  0xc2   :  { %v501_v43 = vor.u32 %v500_v37, %v499_v30  ;;  %vm508_vm10 = vcmp.lt.s32.totalorder %v1480_v8, 4  ;;  %v377_v47 = vshll.u32 %v1494_v19, 16  ;;  %v381_v48 = vadd.s32 %v375_v18, %v371_v15 }
  0xc3   :  { %v504_v49 = vor.u32 %v503_v40, %v502_v39  ;;  %v513_v50 = vsel %vm505_vm6, %v1507_v34, %v1509_v36  ;;  %v380_v53 = vsel %vm379_vm8, 1, %v986_v52  ;;  %v396_v55 = vmul.u32 %v392_v2, %v368_v9 }
  0xc4   :  { %v399_v56 = vshll.u32 %v1500_v23, 16  ;;  %v514_v57 = vsel %vm508_vm10, %v501_v43, 920167782  ;;  %vm401_vm11 = vc.u32 %v393_v20, %v397_v32  ;;  %v1529_v58 = vadd.s32 %v397_v32, %v393_v20  ;;  %v255_v20 = vpop.f32.mrf.mxu0 }
  0xc5   :  { %v515_v59 = vsel %vm507_vm9, %v1513_v38, %v514_v57  ;;  %v517_v60 = vsel %vm505_vm6, %v1509_v36, %v1513_v38  ;;  %v518_v62 = vsel %vm508_vm10, %v504_v49, 1326507024  ;;  %v522_v0 = vand.u32 65535, %v1489_v4 }
  0xc6   :  { %v516_v61 = vsel %vm506_vm7, %v513_v50, %v515_v59  ;;  %v523_v1 = vshrl.u32 %v1489_v4, 16  ;;  %vm383_vm12 = vc.u32 %v381_v48, %v377_v47  ;;  %v519_v2 = vsel %vm507_vm9, %v501_v43, %v518_v62 }
  0xc7   :  { %v546_v3 = vand.u32 65535, %v516_v61  ;;  %v547_v6 = vshrl.u32 %v516_v61, 16  ;;  %v402_v9 = vsel %vm401_vm11, 1, %v986_v52  ;;  %v520_v10 = vsel %vm506_vm7, %v517_v60, %v519_v2 }
  0xc8   :  { %v152_v13 = vperm.slane %v1409_v5, 2  ;;  %vm405_vm13 = vc.u32 %v1529_v58, %v399_v56  ;;  %v524_v14 = vand.u32 65535, %v520_v10  ;;  %v525_v15 = vshrl.u32 %v520_v10, 16 }
  0xc9   :  { %v549_v18 = vmul.u32 %v547_v6, %v522_v0  ;;  %v382_v21 = vadd.s32 %v380_v53, %v374_v41  ;;  %v384_v22 = vsel %vm383_vm12, 1, %v986_v52  ;;  %v548_v25 = vmul.u32 %v546_v3, %v522_v0  ;;  %v275_v53 = vpop.f32.mrf.mxu1 }
  0xca   :  { %v550_v28 = vmul.u32 %v546_v3, %v523_v1  ;;  %v404_v30 = vadd.s32 %v402_v9, %v396_v55  ;;  %v526_v32 = vmul.u32 %v524_v14, %v522_v0  ;;  %v527_v37 = vmul.u32 %v525_v15, %v522_v0 }
  0xcb   :  { %v528_v39 = vmul.u32 %v524_v14, %v523_v1  ;;  %v406_v40 = vsel %vm405_vm13, 1, %v986_v52  ;;  %v551_v43 = vmul.u32 %v547_v6, %v523_v1  ;;  %v552_v47 = vshll.u32 %v549_v18, 16 }
  0xcc   :  { %v256_v48 = vadd.f32 %v255_v20, %v152_v13  ;;  %v529_v49 = vmul.u32 %v525_v15, %v523_v1  ;;  %v530_v50 = vshll.u32 %v527_v37, 16  ;;  %v554_v59 = vshll.u32 %v550_v28, 16 }
  0xcd   :  { %v532_v57 = vshll.u32 %v528_v39, 16  ;;  %v376_v60 = vshrl.u32 %v1478_v7, 16  ;;  %v398_v41 = vshrl.u32 %v1485_v12, 16  ;;  %vm556_vm14 = vc.u32 %v548_v25, %v552_v47 }
  0xce   :  { %vm534_vm15 = vc.u32 %v526_v32, %v530_v50  ;;  %v536_v55 = vadd.s32 %v530_v50, %v526_v32  ;;  %v557_v61 = vsel %vm556_vm14, 1, %v986_v52  ;;  %v558_v62 = vadd.s32 %v552_v47, %v548_v25 }
  0xcf   :  { %v386_v0 = vadd.s32 %v384_v22, %v382_v21  ;;  %v408_v2 = vadd.s32 %v406_v40, %v404_v30  ;;  %v535_v3 = vsel %vm534_vm15, 1, %v986_v52  ;;  %v559_v6 = vadd.s32 %v557_v61, %v551_v43 }
  0xd0   :  { %v537_v1 = vadd.s32 %v535_v3, %v529_v49  ;;  %vm538_vm0 = vc.u32 %v536_v55, %v532_v57  ;;  %vm560_vm5 = vc.u32 %v558_v62, %v554_v59  ;;  %v1559_v9 = vadd.f32 %v275_v53, %v256_v48 }
  0xd1   :  { %v539_v7 = vsel %vm538_vm0, 1, %v986_v52  ;;  %v553_v12 = vshrl.u32 %v549_v18, 16  ;;  %v531_v10 = vshrl.u32 %v527_v37, 16  ;;  %v561_v14 = vsel %vm560_vm5, 1, %v986_v52 }
  0xd2   :  { %v541_v13 = vadd.s32 %v539_v7, %v537_v1  ;;  %v334_v15 = vshrl.u32 %v980_v27, %v1424_v26  ;;  %v400_v20 = vshrl.u32 %v1500_v23, 16  ;;  %v409_v21 = vadd.s32 %v408_v2, %v398_v41 }
  0xd3   :  { %v563_v22 = vadd.s32 %v561_v14, %v559_v6  ;;  %v355_v25 = vsel %vm353_vm2, %v1447_v46, 2102212464  ;;  %v378_v30 = vshrl.u32 %v1494_v19, 16  ;;  %v387_v32 = vadd.s32 %v386_v0, %v376_v60 }
  0xd4   :  { %v631_v18 = vand.u32 2139095040, %v1559_v9  ;;  %v555_v37 = vshrl.u32 %v550_v28, 16  ;;  %v533_v43 = vshrl.u32 %v528_v39, 16  ;;  %v542_v47 = vadd.s32 %v541_v13, %v531_v10 }
  0xd5   :  { %v564_v40 = vadd.s32 %v563_v22, %v553_v12  ;;  %v354_v26 = vsel %vm350_vm1, %v334_v15, %v1443_v44  ;;  %v356_v49 = vsel %vm352_vm3, %v1445_v45, %v355_v25  ;;  %v410_v50 = vadd.s32 %v409_v21, %v400_v20 }
  0xd6   :  { %v632_v48 = vshrl.u32 %v631_v18, 23  ;;  %v1577_v46 = vadd.s32 %v387_v32, %v378_v30  ;;  %v1582_v19 = vadd.s32 %v1529_v58, %v399_v56  ;;  %v489_v28 = vshrl.u32 %v980_v27, %v1483_v63 }
  0xd7   :  { %v510_v44 = vsel %vm508_vm10, %v1513_v38, 2102212464  ;;  %v565_v57 = vadd.s32 %v564_v40, %v555_v37  ;;  %v1589_v60 = vadd.s32 %v542_v47, %v533_v43  ;;  %v1591_v45 = vadd.s32 %v558_v62, %v554_v59 }
  0xd8   :  { %v967_v39 = vadd.s32 4294967169, %v632_v48  ;;  %v357_v23 = vsel %vm351_vm4, %v354_v26, %v356_v49  ;;  %v414_v53 = vadd.s32 1, %v410_v50  ;;  %vm413_vm1 = vc.u32 %v1577_v46, %v1582_v19 }
  0xd9   :  { %v509_v63 = vsel %vm505_vm6, %v489_v28, %v1507_v34  ;;  %v511_v38 = vsel %vm507_vm9, %v1509_v36, %v510_v44  ;;  %v569_v56 = vadd.s32 1, %v565_v57  ;;  %v411_v59 = vmul.u32 %v1460_v54, %v357_v23 }
  0xda   :  { %v638_v41 = vadd.s32 1, %v967_v39  ;;  %vm568_vm3 = vc.u32 %v1589_v60, %v1591_v45  ;;  %v415_v24 = vsel %vm413_vm1, %v414_v53, %v410_v50  ;;  %v512_v55 = vsel %vm506_vm7, %v509_v63, %v511_v38  ;;  %v295_v63 = vpop.f32.mrf.mxu2 }
  0xdb   :  { %v570_v62 = vsel %vm568_vm3, %v569_v56, %v565_v57  ;;  %v416_v34 = vadd.s32 %v415_v24, %v411_v59  ;;  %v566_v2 = vmul.u32 %v1489_v4, %v512_v55  ;;  %v628_v36 = vand.u32 2147483647, %v1559_v9 }
  0xdc   :  { %vm639_vm2 = vcmp.gt.s32.totalorder %v638_v41, 0  ;;  %v153_v57 = vperm.slane %v1409_v5, 3 }
  0xdd   :  { %v640_v58 = vsel %vm639_vm2, %v638_v41, 0  ;;  %v571_v1 = vadd.s32 %v570_v62, %v566_v2  ;;  %v635_v14 = vand.u32 8388607, %v628_v36  ;;  %v417_v25 = vadd.s32 536870912, %v416_v34  ;;  %v315_v2 = vpop.f32.mrf.mxu3 }
  0xde   :  { %v642_v61 = vand.u32 31, %v640_v58  ;;  %v1618_v7 = vshrl.u32 %v640_v58, 5 }
  0xdf   :  { %v572_v30 = vadd.s32 536870912, %v571_v1  ;;  %v636_v37 = vor.u32 8388608, %v635_v14  ;;  %v1644_v47 = vshrl.u32 %v417_v25, 30 }
  0xe0   :  { %v1608_v0 = vsub.s32 32, %v642_v61  ;;  %v645_v3 = vshll.u32 %v980_v27, %v642_v61  ;;  %v648_v6 = vshll.u32 %v981_v29, %v642_v61  ;;  %v654_v12 = vshll.u32 %v983_v33, %v642_v61 }
  0xe1   :  { %v651_v10 = vshll.u32 %v982_v31, %v642_v61  ;;  %v657_v21 = vshll.u32 %v984_v35, %v642_v61  ;;  %vm660_vm4 = vcmp.lt.s32.totalorder %v1618_v7, 1  ;;  %vm663_vm6 = vcmp.lt.s32.totalorder %v1618_v7, 4 }
  0xe2   :  { %v646_v54 = vshrl.u32 %v981_v29, %v1608_v0  ;;  %v649_v8 = vshrl.u32 %v982_v31, %v1608_v0  ;;  %v655_v4 = vshrl.u32 %v984_v35, %v1608_v0  ;;  %v652_v13 = vshrl.u32 %v983_v33, %v1608_v0 }
  0xe3   :  { %v658_v22 = vshrl.u32 %v985_v42, %v1608_v0  ;;  %vm662_vm7 = vcmp.lt.s32.totalorder %v1618_v7, 3  ;;  %v1646_v48 = vshrl.u32 %v572_v30, 30  ;;  %vm661_vm8 = vcmp.lt.s32.totalorder %v1618_v7, 2 }
  0xe4   :  { %v1628_v15 = vor.u32 %v646_v54, %v645_v3  ;;  %v1630_v20 = vor.u32 %v649_v8, %v648_v6  ;;  %v656_v32 = vor.u32 %v655_v4, %v654_v12  ;;  %v1636_v18 = vor.u32 %v652_v13, %v651_v10 }
  0xe5   :  { %v659_v40 = vor.u32 %v658_v22, %v657_v21  ;;  %v1662_v44 = vshll.u32 %v636_v37, 8  ;;  %v419_v41 = vshll.u32 %v1644_v47, 30  ;;  %v574_v23 = vshll.u32 %v1646_v48, 30 }
  0xe6   :  { %v668_v43 = vsel %vm660_vm4, %v1628_v15, %v1630_v20  ;;  %v669_v26 = vsel %vm663_vm6, %v656_v32, 920167782  ;;  %v672_v28 = vsel %vm660_vm4, %v1630_v20, %v1636_v18  ;;  %v296_v61 = vadd.f32 %v295_v63, %v153_v57 }
  0xe7   :  { %v670_v49 = vsel %vm662_vm7, %v1636_v18, %v669_v26  ;;  %v673_v39 = vsel %vm663_vm6, %v659_v40, 1326507024  ;;  %v677_v24 = vand.u32 65535, %v1662_v44  ;;  %v678_v55 = vshrl.u32 %v1662_v44, 16 }
  0xe8   :  { %v671_v50 = vsel %vm661_vm8, %v668_v43, %v670_v49  ;;  %v674_v53 = vsel %vm662_vm7, %v656_v32, %v673_v39  ;;  %v1673_v5 = vsub.s32 %v416_v34, %v419_v41  ;;  %v1675_v62 = vsub.s32 %v571_v1, %v574_v23 }
  0xe9   :  { %v675_v38 = vsel %vm661_vm8, %v672_v28, %v674_v53  ;;  %v702_v56 = vshrl.u32 %v671_v50, 16  ;;  %v701_v8 = vand.u32 65535, %v671_v50  ;;  %v1677_v10 = vadd.f32 %v315_v2, %v296_v61 }
  0xea   :  { %v679_v58 = vand.u32 65535, %v675_v38  ;;  %v680_v59 = vshrl.u32 %v675_v38, 16  ;;  %v422_v13 = vsub.s32 0, %v1673_v5  ;;  %v577_v14 = vsub.s32 0, %v1675_v62 }
  0xeb   :  { %v704_v6 = vmul.u32 %v702_v56, %v677_v24  ;;  %vm576_vm10 = vcmp.lt.s32.totalorder %v1675_v62, 0  ;;  %v703_v30 = vmul.u32 %v701_v8, %v677_v24  ;;  %v705_v32 = vmul.u32 %v701_v8, %v678_v55 }
  0xec   :  { %v682_v3 = vmul.u32 %v680_v59, %v677_v24  ;;  %v683_v54 = vmul.u32 %v679_v58, %v678_v55  ;;  %v681_v12 = vmul.u32 %v679_v58, %v677_v24  ;;  %v684_v21 = vmul.u32 %v680_v59, %v678_v55 }
  0xed   :  { %v707_v25 = vshll.u32 %v704_v6, 16  ;;  %vm421_vm11 = vcmp.lt.s32.totalorder %v1673_v5, 0  ;;  %v786_v40 = vand.u32 2139095040, %v1677_v10  ;;  %v706_v26 = vmul.u32 %v702_v56, %v678_v55 }
  0xee   :  { %v685_v4 = vshll.u32 %v682_v3, 16  ;;  %v687_v22 = vshll.u32 %v683_v54, 16  ;;  %v578_v49 = vsel %vm576_vm10, %v577_v14, %v1675_v62  ;;  %v686_v50 = vshrl.u32 %v682_v3, 16 }
  0xef   :  { %vm711_vm13 = vc.u32 %v703_v30, %v707_v25  ;;  %v423_v57 = vsel %vm421_vm11, %v422_v13, %v1673_v5  ;;  %v709_v41 = vshll.u32 %v705_v32, 16  ;;  %v713_v23 = vadd.s32 %v707_v25, %v703_v30 }
  0xf0   :  { %vm689_vm9 = vc.u32 %v681_v12, %v685_v4  ;;  %v691_v34 = vadd.s32 %v685_v4, %v681_v12  ;;  %v712_v39 = vsel %vm711_vm13, 1, %v986_v52  ;;  %v644_v63 = vshrl.u32 %v980_v27, %v1608_v0 }
  0xf1   :  { %v690_v1 = vsel %vm689_vm9, 1, %v986_v52  ;;  %v714_v53 = vadd.s32 %v712_v39, %v706_v26  ;;  %v787_v58 = vshrl.u32 %v786_v40, 23  ;;  %v579_v59 = vclz %v578_v49 }
  0xf2   :  { %v692_v37 = vadd.s32 %v690_v1, %v684_v21  ;;  %vm693_vm12 = vc.u32 %v691_v34, %v687_v22  ;;  %v665_v56 = vsel %vm663_vm6, %v1636_v18, 2102212464  ;;  %vm715_vm14 = vc.u32 %v713_v23, %v709_v41 }
  0xf3   :  { %v694_v43 = vsel %vm693_vm12, 1, %v986_v52  ;;  %v424_v24 = vclz %v423_v57  ;;  %v688_v55 = vshrl.u32 %v683_v54, 16  ;;  %v716_v61 = vsel %vm715_vm14, 1, %v986_v52 }
  0xf4   :  { %v696_v28 = vadd.s32 %v694_v43, %v692_v37  ;;  %v708_v2 = vshrl.u32 %v704_v6, 16  ;;  %v718_v3 = vadd.s32 %v716_v61, %v714_v53  ;;  %v970_v8 = vadd.s32 4294967169, %v787_v58 }
  0xf5   :  { %v664_v12 = vsel %vm660_vm4, %v644_v63, %v1628_v15  ;;  %v666_v0 = vsel %vm662_vm7, %v1630_v20, %v665_v56  ;;  %v965_v13 = vadd.s32 4294967294, %v579_v59  ;;  %v710_v18 = vshrl.u32 %v705_v32, 16 }
  0xf6   :  { %v697_v38 = vadd.s32 %v696_v28, %v686_v50  ;;  %v719_v14 = vadd.s32 %v718_v3, %v708_v2  ;;  %v793_v21 = vadd.s32 1, %v970_v8  ;;  %v962_v54 = vadd.s32 4294967294, %v424_v24 }
  0xf7   :  { %v1703_v22 = vadd.s32 %v713_v23, %v709_v41  ;;  %v667_v6 = vsel %vm661_vm8, %v664_v12, %v666_v0  ;;  %v783_v25 = vand.u32 2147483647, %v1677_v10  ;;  %vm966_vm5 = vcmp.lt.s32.totalorder %v965_v13, 0 }
  0xf8   :  { %v1701_v4 = vadd.s32 %v697_v38, %v688_v55  ;;  %v720_v34 = vadd.s32 %v719_v14, %v710_v18  ;;  %vm794_vm15 = vcmp.gt.s32.totalorder %v793_v21, 0  ;;  %v721_v30 = vmul.u32 %v1662_v44, %v667_v6 }
  0xf9   :  { %v795_v15 = vsel %vm794_vm15, %v793_v21, 0  ;;  %vm963_vm1 = vcmp.lt.s32.totalorder %v962_v54, 0  ;;  %v790_v37 = vand.u32 8388607, %v783_v25  ;;  %v1715_v40 = vsel %vm966_vm5, 0, %v965_v13 }
  0xfa   :  { %vm723_vm0 = vc.u32 %v1701_v4, %v1703_v22  ;;  %v724_v20 = vadd.s32 1, %v720_v34  ;;  %v797_v1 = vand.u32 31, %v795_v15  ;;  %v1717_v26 = vsel %vm963_vm1, 0, %v962_v54 }
  0xfb   :  { %v587_v44 = vsub.s32 4294967266, %v1715_v40  ;;  %v791_v39 = vor.u32 8388608, %v790_v37  ;;  %v1730_v53 = vshrl.u32 %v795_v15, 5  ;;  %v412_v3 = vadd.s32 %v1582_v19, %v1577_v46 }
  0xfc   :  { %v725_v32 = vsel %vm723_vm0, %v724_v20, %v720_v34  ;;  %v1713_v7 = vsub.s32 32, %v797_v1  ;;  %v800_v63 = vshll.u32 %v980_v27, %v797_v1  ;;  %v803_v38 = vshll.u32 %v981_v29, %v797_v1 }
  0xfd   :  { %v726_v43 = vadd.s32 %v725_v32, %v721_v30  ;;  %v806_v58 = vshll.u32 %v982_v31, %v797_v1  ;;  %v809_v59 = vshll.u32 %v983_v33, %v797_v1  ;;  %v812_v56 = vshll.u32 %v984_v35, %v797_v1 }
  0xfe   :  { %v801_v50 = vshrl.u32 %v981_v29, %v1713_v7  ;;  %v804_v28 = vshrl.u32 %v982_v31, %v1713_v7  ;;  %v807_v57 = vshrl.u32 %v983_v33, %v1713_v7  ;;  %v810_v41 = vshrl.u32 %v984_v35, %v1713_v7 }
  0xff   :  { %v727_v49 = vadd.s32 536870912, %v726_v43  ;;  %v813_v24 = vshrl.u32 %v985_v42, %v1713_v7  ;;  %v428_v33 = vsub.s32 32, %v1717_v26  ;;  %v432_v35 = vsub.s32 4294967266, %v1717_v26 }
 0x100   :  { %v1740_v61 = vor.u32 %v801_v50, %v800_v63  ;;  %v1742_v2 = vor.u32 %v804_v28, %v803_v38  ;;  %v1746_v8 = vor.u32 %v807_v57, %v806_v58  ;;  %v811_v29 = vor.u32 %v810_v41, %v809_v59 }
 0x101   :  { %v1728_v23 = vshrl.u32 %v727_v49, 30  ;;  %v814_v31 = vor.u32 %v813_v24, %v812_v56  ;;  %v567_v42 = vadd.s32 %v1591_v45, %v1589_v60  ;;  %v583_v0 = vsub.s32 32, %v1715_v40 }
 0x102   :  { %v588_v13 = vadd.s32 127, %v587_v44  ;;  %vm815_vm2 = vcmp.lt.s32.totalorder %v1730_v53, 1  ;;  %v1756_v18 = vshll.u32 %v791_v39, 8  ;;  %vm818_vm4 = vcmp.lt.s32.totalorder %v1730_v53, 4 }
 0x103   :  { %v729_v55 = vshll.u32 %v1728_v23, 30  ;;  %v823_v19 = vsel %vm815_vm2, %v1740_v61, %v1742_v2  ;;  %vm817_vm6 = vcmp.lt.s32.totalorder %v1730_v53, 3  ;;  %v824_v60 = vsel %vm818_vm4, %v811_v29, 920167782 }
 0x104   :  { %v827_v45 = vsel %vm815_vm2, %v1742_v2, %v1746_v8  ;;  %v828_v14 = vsel %vm818_vm4, %v814_v31, 1326507024  ;;  %vm816_vm7 = vcmp.lt.s32.totalorder %v1730_v53, 2  ;;  %v825_v54 = vsel %vm817_vm6, %v1746_v8, %v824_v60 }
 0x105   :  { %v1752_v12 = vsub.s32 %v726_v43, %v729_v55  ;;  %v829_v6 = vsel %vm817_vm6, %v811_v29, %v828_v14  ;;  %v433_v34 = vadd.s32 127, %v432_v35  ;;  %v826_v20 = vsel %vm816_vm7, %v823_v19, %v825_v54 }
 0x106   :  { %v830_v1 = vsel %vm816_vm7, %v827_v45, %v829_v6  ;;  %v585_v30 = vshrl.u32 %v567_v42, %v583_v0  ;;  %v589_v32 = vshll.u32 %v588_v13, 23  ;;  %v832_v37 = vand.u32 65535, %v1756_v18 }
 0x107   :  { %vm731_vm3 = vcmp.lt.s32.totalorder %v1752_v12, 0  ;;  %v732_v46 = vsub.s32 0, %v1752_v12  ;;  %v834_v43 = vand.u32 65535, %v830_v1  ;;  %v833_v50 = vshrl.u32 %v1756_v18, 16 }
 0x108   :  { %v835_v28 = vshrl.u32 %v830_v1, 16  ;;  %v857_v44 = vshrl.u32 %v826_v20, 16  ;;  %v429_v39 = vshll.u32 %v1673_v5, %v1717_v26  ;;  %v430_v57 = vshrl.u32 %v412_v3, %v428_v33 }
 0x109   :  { %v733_v21 = vsel %vm731_vm3, %v732_v46, %v1752_v12  ;;  %v584_v41 = vshll.u32 %v1675_v62, %v1715_v40  ;;  %v856_v63 = vand.u32 65535, %v826_v20  ;;  %v434_v38 = vshll.u32 %v433_v34, 23 }
 0x10a   :  { %v734_v15 = vclz %v733_v21  ;;  %v837_v58 = vmul.u32 %v835_v28, %v832_v37  ;;  %v838_v59 = vmul.u32 %v834_v43, %v833_v50  ;;  %v590_v24 = vor.u32 4788187, %v589_v32 }
 0x10b   :  { %v586_v56 = vor.u32 %v585_v30, %v584_v41  ;;  %v859_v29 = vmul.u32 %v857_v44, %v832_v37  ;;  %v836_v42 = vmul.u32 %v834_v43, %v832_v37  ;;  %v722_v5 = vadd.s32 %v1703_v22, %v1701_v4 }
 0x10c   :  { %v968_v49 = vadd.s32 4294967294, %v734_v15  ;;  %v840_v0 = vshll.u32 %v837_v58, 16  ;;  %v839_v26 = vmul.u32 %v835_v28, %v833_v50  ;;  %v860_v3 = vmul.u32 %v856_v63, %v833_v50 }
 0x10d   :  { %v862_v33 = vshll.u32 %v859_v29, 16  ;;  %v842_v40 = vshll.u32 %v838_v59, 16  ;;  %v591_v46 = vand.u32 2147483647, %v590_v24  ;;  %v858_v60 = vmul.u32 %v856_v63, %v832_v37 }
 0x10e   :  { %vm969_vm8 = vcmp.lt.s32.totalorder %v968_v49, 0  ;;  %vm844_vm9 = vc.u32 %v836_v42, %v840_v0  ;;  %v846_v13 = vadd.s32 %v840_v0, %v836_v42  ;;  %v861_v45 = vmul.u32 %v857_v44, %v833_v50 }
 0x10f   :  { %v737_v55 = vsel %vm969_vm8, 0, %v968_v49  ;;  %v845_v19 = vsel %vm844_vm9, 1, %v986_v52  ;;  %v864_v34 = vshll.u32 %v860_v3, 16  ;;  %vm866_vm11 = vc.u32 %v858_v60, %v862_v33 }
 0x110   :  { %v738_v31 = vsub.s32 32, %v737_v55  ;;  %v742_v35 = vsub.s32 4294967266, %v737_v55  ;;  %v847_v54 = vadd.s32 %v845_v19, %v839_v26  ;;  %vm848_vm10 = vc.u32 %v846_v13, %v842_v40 }
 0x111   :  { %v849_v6 = vsel %vm848_vm10, 1, %v986_v52  ;;  %v868_v4 = vadd.s32 %v862_v33, %v858_v60  ;;  %v820_v22 = vsel %vm818_vm4, %v1746_v8, 2102212464  ;;  %v841_v15 = vshrl.u32 %v837_v58, 16 }
 0x112   :  { %v743_v62 = vadd.s32 127, %v742_v35  ;;  %v740_v14 = vshrl.u32 %v722_v5, %v738_v31  ;;  %v851_v20 = vadd.s32 %v849_v6, %v847_v54  ;;  %v867_v1 = vsel %vm866_vm11, 1, %v986_v52 }
 0x113   :  { %v739_v30 = vshll.u32 %v1752_v12, %v737_v55  ;;  %v869_v37 = vadd.s32 %v867_v1, %v861_v45  ;;  %vm870_vm12 = vc.u32 %v868_v4, %v864_v34  ;;  %v799_v43 = vshrl.u32 %v980_v27, %v1713_v7 }
 0x114   :  { %v744_v21 = vshll.u32 %v743_v62, 23  ;;  %v843_v49 = vshrl.u32 %v838_v59, 16  ;;  %v852_v50 = vadd.s32 %v851_v20, %v841_v15  ;;  %v871_v28 = vsel %vm870_vm12, 1, %v986_v52 }
 0x115   :  { %v435_v44 = vor.u32 4788187, %v434_v38  ;;  %v741_v41 = vor.u32 %v740_v14, %v739_v30  ;;  %v863_v63 = vshrl.u32 %v859_v29, 16  ;;  %v873_v8 = vadd.s32 %v871_v28, %v869_v37 }
 0x116   :  { %v745_v32 = vor.u32 4788187, %v744_v21  ;;  %v593_v58 = vcvt.s32.f32 %v586_v56  ;;  %v819_v24 = vsel %vm815_vm2, %v799_v43, %v1740_v61  ;;  %v821_v12 = vsel %vm817_vm6, %v1742_v2, %v820_v22 }
 0x117   :  { %v853_v55 = vadd.s32 %v852_v50, %v843_v49  ;;  %v865_v27 = vshrl.u32 %v860_v3, 16  ;;  %v874_v7 = vadd.s32 %v873_v8, %v863_v63  ;;  %v431_v59 = vor.u32 %v430_v57, %v429_v39 }
 0x118   :  { %v746_v31 = vand.u32 2147483647, %v745_v32  ;;  %v594_v35 = vmul.f32 %v593_v58, %v591_v46  ;;  %v872_v52 = vadd.s32 %v868_v4, %v864_v34  ;;  %v748_v38 = vcvt.s32.f32 %v741_v41 }
 0x119   :  { %v822_v29 = vsel %vm816_vm7, %v819_v24, %v821_v12  ;;  %v875_v56 = vadd.s32 %v874_v7, %v865_v27  ;;  %v436_v42 = vand.u32 2147483647, %v435_v44  ;;  %v438_v5 = vcvt.s32.f32 %v431_v59 }
 0x11a   :  { %vm878_vm13 = vc.u32 %v853_v55, %v872_v52  ;;  %v749_v0 = vmul.f32 %v748_v38, %v746_v31  ;;  %v595_v26 = vxor.u32 2147483648, %v594_v35  ;;  %v876_v2 = vmul.u32 %v1756_v18, %v822_v29 }
 0x11b   :  { %v879_v61 = vadd.s32 1, %v875_v56  ;;  %v439_v62 = vmul.f32 %v438_v5, %v436_v42  ;;  %vm475_vm14 = vcmp.lt.s32.totalorder %v1416_v16, 0  ;;  %vm1817_vm15 = vcmp.le.f32.partialorder %v473_v51, 0.7853982 }
 0x11c   :  { %v750_v39 = vxor.u32 2147483648, %v749_v0  ;;  %v596_v57 = vsel %vm475_vm14, %v595_v26, %v594_v35  ;;  %vm630_vm0 = vcmp.lt.s32.totalorder %v1559_v9, 0  ;;  %vm320_vm5 = vcmp.lt.s32.totalorder %v1413_v11, 0 }
 0x11d   :  { %v880_v33 = vsel %vm878_vm13, %v879_v61, %v875_v56  ;;  %v440_v40 = vxor.u32 2147483648, %v439_v62  ;;  %v1827_v46 = vsel %vm1817_vm15, %v1416_v16, %v596_v57  ;;  %vm1835_vm1 = vcmp.le.f32.partialorder %v628_v36, 0.7853982 }
 0x11e   :  { %v881_v3 = vadd.s32 %v880_v33, %v876_v2  ;;  %v751_v19 = vsel %vm630_vm0, %v750_v39, %v749_v0  ;;  %v1843_v14 = vmul.f32 %v1827_v46, %v1827_v46  ;;  %vm1852_vm2 = vcmp.le.f32.partialorder %v318_v17, 0.7853982 }
 0x11f   :  { %v441_v45 = vsel %vm320_vm5, %v440_v40, %v439_v62  ;;  %v1848_v21 = vsel %vm1835_vm1, %v1559_v9, %v751_v19  ;;  %v877_v28 = vadd.s32 %v872_v52, %v853_v55  ;;  %v597_v42 = vsub.s32 4, %v1646_v48 }
 0x120   :  { %v882_v53 = vadd.s32 536870912, %v881_v3  ;;  %v1859_v34 = vsel %vm1852_vm2, %v1413_v11, %v441_v45  ;;  %v1863_v4 = vmul.f32 %v1848_v21, %v1848_v21  ;;  %v609_v22 = vmul.f32 -0.00019511016, %v1843_v14 }
 0x121   :  { %v1868_v17 = vmul.f32 %v1859_v34, %v1859_v34  ;;  %v602_v43 = vmul.f32 -0.001358992, %v1843_v14  ;;  %v752_v62 = vsub.s32 4, %v1728_v23  ;;  %v442_v57 = vsub.s32 4, %v1644_v47 }
 0x122   :  { %v1822_v18 = vshrl.u32 %v882_v53, 30  ;;  %v764_v1 = vmul.f32 -0.00019511016, %v1863_v4  ;;  %v610_v32 = vadd.f32 0.008332121, %v609_v22  ;;  %v598_v40 = vsel %vm475_vm14, %v597_v42, %v1646_v48 }
 0x123   :  { %v454_v37 = vmul.f32 -0.00019511016, %v1868_v17  ;;  %v757_v8 = vmul.f32 -0.001358992, %v1863_v4  ;;  %v603_v27 = vadd.f32 0.041655596, %v602_v43  ;;  %v753_v22 = vsel %vm630_vm0, %v752_v62, %v1728_v23 }
 0x124   :  { %v884_v60 = vshll.u32 %v1822_v18, 30  ;;  %v765_v50 = vadd.f32 0.008332121, %v764_v1  ;;  %v611_v63 = vmul.f32 %v610_v32, %v1843_v14  ;;  %v447_v38 = vmul.f32 -0.001358992, %v1868_v17 }
 0x125   :  { %v455_v31 = vadd.f32 0.008332121, %v454_v37  ;;  %v758_v56 = vadd.f32 0.041655596, %v757_v8  ;;  %v604_v0 = vmul.f32 %v603_v27, %v1843_v14  ;;  %vm785_vm6 = vcmp.lt.s32.totalorder %v1677_v10, 0 }
 0x126   :  { %v885_v54 = vsub.s32 %v881_v3, %v884_v60  ;;  %v766_v7 = vmul.f32 %v765_v50, %v1863_v4  ;;  %v612_v29 = vadd.f32 -0.16666654, %v611_v63  ;;  %v448_v2 = vadd.f32 0.041655596, %v447_v38 }
 0x127   :  { %v456_v52 = vmul.f32 %v455_v31, %v1868_v17  ;;  %v759_v3 = vmul.f32 %v758_v56, %v1863_v4  ;;  %v605_v19 = vadd.f32 -0.4999988, %v604_v0  ;;  %vm1897_vm7 = vcmp.le.f32.partialorder %v783_v25, 0.7853982 }
 0x128   :  { %vm886_vm3 = vcmp.lt.s32.totalorder %v885_v54, 0  ;;  %v887_v6 = vsub.s32 0, %v885_v54  ;;  %v767_v61 = vadd.f32 -0.16666654, %v766_v7  ;;  %v613_v33 = vmul.f32 %v612_v29, %v1843_v14 }
 0x129   :  { %v457_v53 = vadd.f32 -0.16666654, %v456_v52  ;;  %v907_v32 = vsub.s32 4, %v1822_v18  ;;  %v606_v25 = vmul.f32 %v605_v19, %v1843_v14  ;;  %v755_v37 = vsel %vm1835_vm1, 0, %v753_v22 }
 0x12a   :  { %v888_v15 = vsel %vm886_vm3, %v887_v6, %v885_v54  ;;  %v768_v60 = vmul.f32 %v767_v61, %v1863_v4  ;;  %v614_v6 = vadd.f32 1.0, %v613_v33  ;;  %vm616_vm8 = vweird.f32 %v1416_v16 }
 0x12b   :  { %v889_v20 = vclz %v888_v15  ;;  %v600_v15 = vsel %vm1817_vm15, 0, %v598_v40  ;;  %v458_v23 = vmul.f32 %v457_v53, %v1868_v17  ;;  %v908_v51 = vsel %vm785_vm6, %v907_v32, %v1822_v18 }
 0x12c   :  { %v769_v43 = vadd.f32 1.0, %v768_v60  ;;  %v607_v14 = vadd.f32 1.0, %v606_v25  ;;  %vm771_vm1 = vweird.f32 %v1559_v9  ;;  %v952_v32 = vlaneseq }
 0x12d   :  { %v971_v30 = vadd.s32 4294967294, %v889_v20  ;;  %v760_v20 = vadd.f32 -0.4999988, %v759_v3 }
 0x12f   :  { %vm972_vm4 = vcmp.lt.s32.totalorder %v971_v30, 0 }
 0x130   :  { %v892_v49 = vsel %vm972_vm4, 0, %v971_v30  ;;  %v443_v30 = vsel %vm320_vm5, %v442_v57, %v1644_v47 }
 0x131   :  { %v893_v44 = vsub.s32 32, %v892_v49  ;;  %v897_v41 = vsub.s32 4294967266, %v892_v49  ;;  %v894_v58 = vshll.u32 %v885_v54, %v892_v49  ;;  %v449_v54 = vmul.f32 %v448_v2, %v1868_v17 }
 0x132   :  { %v445_v47 = vsel %vm1852_vm2, 0, %v443_v30 }
 0x133   :  { %v895_v24 = vshrl.u32 %v877_v28, %v893_v44  ;;  %v898_v12 = vadd.s32 127, %v897_v41  ;;  %v450_v50 = vadd.f32 -0.4999988, %v449_v54  ;;  %v615_v28 = vmul.f32 %v614_v6, %v1827_v46 }
 0x134   :  { %v617_v44 = vadd.s32 3, %v600_v15  ;;  %v761_v41 = vmul.f32 %v760_v20, %v1863_v4  ;;  %v462_v7 = vadd.s32 3, %v445_v47  ;;  %v910_v4 = vsel %vm1897_vm7, 0, %v908_v51 }
 0x135   :  { %v896_v59 = vor.u32 %v895_v24, %v894_v58  ;;  %v899_v35 = vshll.u32 %v898_v12, 23  ;;  %v459_v58 = vadd.f32 1.0, %v458_v23  ;;  %v772_v24 = vadd.s32 3, %v755_v37 }
 0x136   :  { %v770_v12 = vmul.f32 %v769_v43, %v1848_v21  ;;  %v451_v46 = vmul.f32 %v450_v50, %v1868_v17  ;;  %v618_v36 = vand.u32 3, %v617_v44  ;;  %v463_v17 = vand.u32 3, %v462_v7 }
 0x137   :  { %v900_v55 = vor.u32 4788187, %v899_v35  ;;  %v903_v26 = vcvt.s32.f32 %v896_v59  ;;  %v621_v59 = vxor.u32 2147483648, %v615_v28  ;;  %v762_v35 = vadd.f32 1.0, %v761_v41 }
 0x138   :  { %v460_v56 = vmul.f32 %v459_v58, %v1859_v34  ;;  %v773_v18 = vand.u32 3, %v772_v24  ;;  %v776_v21 = vxor.u32 2147483648, %v770_v12  ;;  %v452_v0 = vadd.f32 1.0, %v451_v46 }
 0x139   :  { %v901_v5 = vand.u32 2147483647, %v900_v55  ;;  %v624_v55 = vxor.u32 2147483648, %v607_v14  ;;  %vm620_vm9 = vcmp.eq.s32.totalorder %v618_v36, 0  ;;  %v927_v61 = vadd.s32 3, %v910_v4 }
 0x13a   :  { %v466_v62 = vxor.u32 2147483648, %v460_v56  ;;  %vm619_vm10 = vcmp.lt.s32.totalorder %v618_v36, 2  ;;  %vm623_vm11 = vcmp.eq.s32.totalorder %v618_v36, 2  ;;  %vm775_vm12 = vcmp.eq.s32.totalorder %v773_v18, 0 }
 0x13b   :  { %v904_v39 = vmul.f32 %v903_v26, %v901_v5  ;;  %v622_v5 = vsel %vm620_vm9, %v607_v14, %v621_v59  ;;  %v779_v26 = vxor.u32 2147483648, %v762_v35  ;;  %v625_v34 = vsel %vm623_vm11, %v624_v55, %v615_v28 }
 0x13c   :  { %v777_v3 = vsel %vm775_vm12, %v762_v35, %v776_v21  ;;  %v469_v53 = vxor.u32 2147483648, %v452_v0  ;;  %v626_v40 = vsel %vm619_vm10, %v622_v5, %v625_v34  ;;  %vm778_vm13 = vcmp.eq.s32.totalorder %v773_v18, 2 }
 0x13d   :  { %v905_v45 = vxor.u32 2147483648, %v904_v39  ;;  %v928_v19 = vand.u32 3, %v927_v61  ;;  %vm774_vm14 = vcmp.lt.s32.totalorder %v773_v18, 2  ;;  %v780_v60 = vsel %vm778_vm13, %v779_v26, %v770_v12 }
 0x13e   :  { %vm464_vm15 = vcmp.lt.s32.totalorder %v463_v17, 2  ;;  %vm465_vm0 = vcmp.eq.s32.totalorder %v463_v17, 0  ;;  %vm468_vm5 = vcmp.eq.s32.totalorder %v463_v17, 2  ;;  %v781_v6 = vsel %vm774_vm14, %v777_v3, %v780_v60 }
 0x13f   :  { %v906_v1 = vsel %vm785_vm6, %v905_v45, %v904_v39  ;;  %v467_v22 = vsel %vm465_vm0, %v452_v0, %v466_v62  ;;  %v627_v15 = vsel %vm616_vm8, nan, %v626_v40  ;;  %v470_v48 = vsel %vm468_vm5, %v469_v53, %v460_v56 }
 0x140   :  { %v909_v13 = vsel %vm1897_vm7, %v1677_v10, %v906_v1  ;;  %vm929_vm2 = vcmp.lt.s32.totalorder %v928_v19, 2  ;;  %vm930_vm3 = vcmp.eq.s32.totalorder %v928_v19, 0  ;;  %vm933_vm4 = vcmp.eq.s32.totalorder %v928_v19, 2 }
 0x141   :  { %v911_v49 = vmul.f32 %v909_v13, %v909_v13  ;;  %v782_v1 = vsel %vm771_vm1, nan, %v781_v6  ;;  %v942_v25 = vrot.slane %v627_v15, 7  ;;  %vm926_vm6 = vweird.f32 %v1677_v10 }
 0x142   :  { %vm945_vm7 = vcmask 1040384   ;;  %vm947_vm8 = vcmask 1042434   ;;  %vm461_vm9 = vweird.f32 %v1413_v11  ;;  %v943_v9 = vrot.slane %v782_v1, 6 }
 0x143   :  { %v912_v63 = vmul.f32 -0.001358992, %v911_v49  ;;  %v919_v8 = vmul.f32 -0.00019511016, %v911_v49  ;;  %vm949_vm10 = vcmask 1041408   ;;  %vm954_vm11 = vcmp.lt.s32.totalorder %v952_v32, 512 }
 0x145   :  { %v913_v31 = vadd.f32 0.041655596, %v912_v63  ;;  %v920_v27 = vadd.f32 0.008332121, %v919_v8 }
 0x147   :  { %v914_v38 = vmul.f32 %v913_v31, %v911_v49  ;;  %v921_v29 = vmul.f32 %v920_v27, %v911_v49 }
 0x149   :  { %v915_v52 = vadd.f32 -0.4999988, %v914_v38  ;;  %v922_v42 = vadd.f32 -0.16666654, %v921_v29 }
 0x14b   :  { %v916_v2 = vmul.f32 %v915_v52, %v911_v49  ;;  %v923_v33 = vmul.f32 %v922_v42, %v911_v49 }
 0x14d   :  { %v917_v39 = vadd.f32 1.0, %v916_v2  ;;  %v924_v57 = vadd.f32 1.0, %v923_v33 }
 0x14f   :  { %v925_v45 = vmul.f32 %v924_v57, %v909_v13  ;;  %v934_v54 = vxor.u32 2147483648, %v917_v39  ;;  %v471_v13 = vsel %vm464_vm15, %v467_v22, %v470_v48 }
 0x150   :  { %v472_v49 = vsel %vm461_vm9, nan, %v471_v13 }
 0x151   :  { %v931_v20 = vxor.u32 2147483648, %v925_v45  ;;  %v935_v23 = vsel %vm933_vm4, %v934_v54, %v925_v45  ;;  %v946_v50 = vsel %vm945_vm7, %v472_v49, %v942_v25 }
 0x153   :  { %v932_v30 = vsel %vm930_vm3, %v917_v39, %v931_v20 }
 0x154   :  { %v936_v37 = vsel %vm929_vm2, %v932_v30, %v935_v23 }
 0x155   :  { %v937_v16 = vsel %vm926_vm6, nan, %v936_v37 }
 0x156   :  { %v944_v43 = vrot.slane %v937_v16, 5 }
 0x158   :  { %v948_v28 = vsel %vm947_vm8, %v943_v9, %v944_v43 }
 0x159   :  { %v950_v44 = vsel %vm949_vm10, %v946_v50, %v948_v28 }
 0x15a   :  { %956 = vst.msk [vmem:[%s1939_s3] sm:$0xf] %vm954_vm11, %v950_v44 }

</bundles_post_ra>
